<compile_context>
chip_gen: v6e
topology: v6e:2x2x1
jax: 0.10.0
libtpu: 0.0.40
codegen_flags: <defaults>
</compile_context>

<pallas_src>
import functools

import jax
import jax.numpy as jnp
from jax.experimental import pallas as pl
from jax.experimental.pallas import tpu as pltpu


def _round_up(a: int, m: int) -> int:
    return ((a + m - 1) // m) * m


def _tpu_kind() -> str:
    """Best-effort device-generation string ('' if unknown / not TPU)."""
    try:
        dev = jax.devices()[0]
        if dev.platform != "tpu":
            return ""
        return dev.device_kind.lower()
    except Exception:
        return ""


def fcn_kernel(x_ref, w0_ref, b0_ref, wh_ref, bh_ref, we_ref, be_ref, o_ref,
               *, n_hidden_layers, n_fch_passes, n_chains, mxu_dtype):
    """Whole packed MLP forward for one batch tile, entirely in VMEM.

    x_ref  : (tile_rows, pack)   compact packed scalar inputs (one lane / group)
    w0_ref : (pack, 128)         input layer folded with the lane-group broadcast
    b0_ref : (1, 128)            f32
    wh_ref : (n_hl, 128, 128)    block-diagonal hidden weights (shared by passes)
    bh_ref : (n_hl, 1, 128)      f32
    we_ref : (128, 128)          output layer as a lane-dense slab
    be_ref : (1, 128)            f32
    o_ref  : (tile_rows, 128)    lane-dense output slab (unmasked vst)
    """
    w0 = w0_ref[...]
    b0 = b0_ref[...]
    we = we_ref[...]
    be = be_ref[...]

    def chain(row_slice):
        # Input layer: K == pack (tiny matmul).  Folding the per-group lane
        # broadcast into W0c means the wrapper never materializes a repeated
        # (rows, 128) input -> 32x less input HBM traffic / DMA.
        x = x_ref[row_slice, :].astype(mxu_dtype)
        h = jnp.tanh(jnp.dot(x, w0, preferred_element_type=jnp.float32) + b0)
        # `fch` applied n_fch_passes times with the SAME weights, exactly like
        # the PyTorch forward.  Do NOT hoist wh_ref[...] into vregs up front:
        # 2x(128,128) + We would eat most of the vreg file and spill.
        for _ in range(n_fch_passes):
            for j in range(n_hidden_layers):
                h = jnp.tanh(
                    jnp.dot(h.astype(mxu_dtype), wh_ref[j],
                            preferred_element_type=jnp.float32)
                    + bh_ref[j])
        # Output layer folded into the packed layout (lane-dense slab).
        return jnp.dot(h.astype(mxu_dtype), we,
                       preferred_element_type=jnp.float32) + be

    rows = x_ref.shape[0]
    chunk = rows // n_chains
    for c in range(n_chains):
        sl = slice(c * chunk, (c + 1) * chunk)
        o_ref[sl, :] = chain(sl).astype(o_ref.dtype)


def fcn_forward_pallas(x, params, *, n_layers, n_fch_passes=3,
                       tile_rows=None, max_tile_rows=2048, use_bf16=None):
    """x: (B, 1) float32.  params: dict of pre-transposed (in, out) weights."""
    w0, b0, wh, bh, we, be = (params[k] for k in ("w0", "b0", "wh", "bh", "we", "be"))
    B, n_in = x.shape
    n_hidden = w0.shape[1]
    n_out = we.shape[1]
    n_hl = n_layers - 1

    assert n_in == 1, "packed kernel assumes a scalar (time) input, as in the PINN module"
    assert n_hl >= 1
    assert 128 % n_hidden == 0, "n_hidden must divide the 128-lane vreg width"
    assert n_out <= n_hidden

    pack = 128 // n_hidden      # batch groups packed along the lane axis
    feat = pack * n_hidden      # 128

    # ---- generation-dependent knobs ----
    kind = _tpu_kind()
    is_v7 = ("v7" in kind) or ("7x" in kind)
    is_v6 = "v6" in kind
    if use_bf16 is None:
        use_bf16 = is_v6 or is_v7          # v5e and older: keep f32
    mxu_dtype = jnp.bfloat16 if use_bf16 else jnp.float32
    # Explicit VMEM budget: plenty for these tiles; leave 2x more headroom on
    # v7x (64 MiB physical per TC) than on v5e/v6e (128 MiB physical).
    vmem_limit = (32 << 20) if is_v7 else (64 << 20)

    # ---- packed-row tiling (rows = batch / pack) ----
    r_min = _round_up(-(-B // pack), 8)                 # sublane-aligned rows needed
    if tile_rows is None:
        tile_rows = min(r_min, max_tile_rows)
        # Only v7x (2 TensorCores) benefits from manufacturing >=2 grid steps,
        # and only when each core gets enough rows to amortize per-step and
        # weight-streaming overhead.  v5e/v6e: one grid step is strictly better.
        if is_v7 and r_min >= 1024 and tile_rows == r_min:
            tile_rows = _round_up(-(-r_min // 2), 8)
    tile_rows = _round_up(tile_rows, 8)
    r_total = _round_up(r_min, tile_rows)
    b_pad = r_total * pack
    grid = (r_total // tile_rows,)
    # Split a tile into 2 independent chains only when each chain still has
    # >=128 rows (LHS streaming dominates the MXU); otherwise splitting just
    # doubles the weight streams for negligible tanh overlap.
    n_chains = 2 if (tile_rows >= 256 and tile_rows % 16 == 0) else 1

    # ---- pack input: `pack` contiguous batch groups side by side, COMPACT
    # (one lane per group; no 32x lane expansion in the wrapper) ----
    x_flat = jnp.pad(x.reshape(B).astype(jnp.float32), (0, b_pad - B))
    x_packed = x_flat.reshape(pack, r_total).T          # (rows, pack)

    # ---- pack weights once in the wrapper (pure layout plumbing) ----
    eye = jnp.eye(pack, dtype=jnp.float32)
    # Input layer folded with the group broadcast: W0c[g, g*H + k] = w0[0, k]
    w0c = jnp.einsum("gp,k->gpk", eye, w0[0].astype(jnp.float32)).reshape(pack, feat)
    b0_t = jnp.tile(b0.reshape(1, n_hidden), (1, pack)).astype(jnp.float32)
    wh_bd = jnp.einsum("gh,lij->lgihj", eye,
                       wh.astype(jnp.float32)).reshape(n_hl, feat, feat)
    bh_t = jnp.tile(bh.reshape(n_hl, 1, n_hidden), (1, 1, pack)).astype(jnp.float32)
    we_slab = jnp.zeros((feat, feat), jnp.float32)
    be_slab = jnp.zeros((1, feat), jnp.float32)
    for g in range(pack):
        we_slab = we_slab.at[g * n_hidden:(g + 1) * n_hidden,
                             g * n_out:(g + 1) * n_out].set(we)
        be_slab = be_slab.at[0, g * n_out:(g + 1) * n_out].set(be[0])

    # MXU operands in bf16 on v6e/v7x (accumulation stays f32); biases f32.
    w0c = w0c.astype(mxu_dtype)
    wh_bd = wh_bd.astype(mxu_dtype)
    we_slab = we_slab.astype(mxu_dtype)

    kernel = functools.partial(fcn_kernel, n_hidden_layers=n_hl,
                               n_fch_passes=n_fch_passes, n_chains=n_chains,
                               mxu_dtype=mxu_dtype)

    # NOTE: the six weight/bias operands have constant index_maps, so they stay
    # VMEM-resident across grid steps; pl.Buffered(1) single-buffering was
    # considered but skipped (tiny saving, not worth any lowering risk here).
    out_slab = pl.pallas_call(
        kernel,
        out_shape=jax.ShapeDtypeStruct((r_total, feat), jnp.float32),
        grid_spec=pltpu.PrefetchScalarGridSpec(
            num_scalar_prefetch=0,
            grid=grid,
            in_specs=[
                pl.BlockSpec((tile_rows, pack), lambda i: (i, 0)),       # x compact
                pl.BlockSpec((pack, feat), lambda i: (0, 0)),            # W0 folded
                pl.BlockSpec((1, feat), lambda i: (0, 0)),               # b0
                pl.BlockSpec((n_hl, feat, feat), lambda i: (0, 0, 0)),   # Wh block-diag
                pl.BlockSpec((n_hl, 1, feat), lambda i: (0, 0, 0)),      # bh
                pl.BlockSpec((feat, feat), lambda i: (0, 0)),            # We slab
                pl.BlockSpec((1, feat), lambda i: (0, 0)),               # be slab
            ],
            out_specs=pl.BlockSpec((tile_rows, feat), lambda i: (i, 0)),  # lane-dense
        ),
        compiler_params=pltpu.CompilerParams(
            dimension_semantics=("parallel",),
            vmem_limit_bytes=vmem_limit,
        ),
    )(x_packed, w0c, b0_t, wh_bd, bh_t, we_slab, be_slab)

    # ---- unpack: lane group g holds batch rows [g*r_total, (g+1)*r_total) ----
    out_cols = out_slab[:, : pack * n_out].reshape(r_total, pack, n_out)
    out_full = jnp.transpose(out_cols, (1, 0, 2)).reshape(b_pad, n_out)
    return out_full[:B].astype(x.dtype)


def init_params(key, n_input, n_output, n_hidden, n_layers):
    """nn.Linear-style U(-1/sqrt(fan_in), +1/sqrt(fan_in)) init, (in, out) layout."""
    ks = jax.random.split(key, 6)
    n_hl = n_layers - 1

    def uni(k, shape, fan_in):
        bound = 1.0 / jnp.sqrt(jnp.float32(fan_in))
        return jax.random.uniform(k, shape, jnp.float32, -bound, bound)

    return {
        "w0": uni(ks[0], (n_input, n_hidden), n_input),
        "b0": uni(ks[1], (1, n_hidden), n_input),
        "wh": uni(ks[2], (n_hl, n_hidden, n_hidden), n_hidden),
        "bh": uni(ks[3], (n_hl, 1, n_hidden), n_hidden),
        "we": uni(ks[4], (n_hidden, n_output), n_hidden),
        "be": uni(ks[5], (1, n_output), n_hidden),
    }


def fcn_forward_ref(x, params, *, n_layers):
    """Pure-JAX reference (matches the PyTorch forward: fcs, 3x fch, fce)."""
    h = jnp.tanh(x @ params["w0"] + params["b0"])
    for _ in range(3):
        for j in range(n_layers - 1):
            h = jnp.tanh(h @ params["wh"][j] + params["bh"][j])
    return h @ params["we"] + params["be"]


if __name__ == "__main__":
    # Shapes implied by the module: PINN over time -> N_INPUT=1, N_OUTPUT=1.
    N_INPUT, N_OUTPUT, N_HIDDEN, N_LAYERS = 1, 1, 32, 3
    BATCH = 128

    key = jax.random.PRNGKey(0)
    k_x, k_p = jax.random.split(key)

    x = jax.random.uniform(k_x, (BATCH, N_INPUT), jnp.float32, 0.0, 10.0)
    params = init_params(k_p, N_INPUT, N_OUTPUT, N_HIDDEN, N_LAYERS)

    kind = _tpu_kind()
    use_bf16 = ("v6" in kind) or ("v7" in kind) or ("7x" in kind)

    out = fcn_forward_pallas(x, params, n_layers=N_LAYERS, use_bf16=use_bf16)
    out = jax.block_until_ready(out)

    ref = fcn_forward_ref(x, params, n_layers=N_LAYERS)
    assert out.shape == (BATCH, N_OUTPUT)
    tol = 2e-2 if use_bf16 else 1e-4   # bf16 MXU operands need a looser check
    assert jnp.allclose(out, ref, atol=tol, rtol=tol), "mismatch vs JAX reference"

    print("KERNEL_OK")
</pallas_src>

<mosaic_0001>
module attributes {stable_mosaic.version = 11 : i64} {
  func.func @fcn_kernel(%arg0: i32, %arg1: memref<32x4xf32, #tpu.memory_space<vmem>>, %arg2: memref<4x128xf32, #tpu.memory_space<vmem>>, %arg3: memref<1x128xf32, #tpu.memory_space<vmem>>, %arg4: memref<2x128x128xf32, #tpu.memory_space<vmem>>, %arg5: memref<2x1x128xf32, #tpu.memory_space<vmem>>, %arg6: memref<128x128xf32, #tpu.memory_space<vmem>>, %arg7: memref<1x128xf32, #tpu.memory_space<vmem>>, %arg8: memref<32x128xf32, #tpu.memory_space<vmem>>) attributes {dimension_semantics = [#tpu.dimension_semantics<parallel>], iteration_bounds = array<i64: 1>, scalar_prefetch = 0 : i64, scratch_operands = 0 : i64, tpu.core_type = #tpu.core_type<tc>, window_params = [{transform_indices = @transform_0, window_bounds = array<i64: 32, 4>}, {pipeline_mode = #tpu.pipeline_mode<synchronous>, transform_indices = @transform_1, window_bounds = array<i64: 4, 128>}, {pipeline_mode = #tpu.pipeline_mode<synchronous>, transform_indices = @transform_2, window_bounds = array<i64: 1, 128>}, {pipeline_mode = #tpu.pipeline_mode<synchronous>, transform_indices = @transform_3, window_bounds = array<i64: 2, 128, 128>}, {pipeline_mode = #tpu.pipeline_mode<synchronous>, transform_indices = @transform_4, window_bounds = array<i64: 2, 1, 128>}, {pipeline_mode = #tpu.pipeline_mode<synchronous>, transform_indices = @transform_5, window_bounds = array<i64: 128, 128>}, {pipeline_mode = #tpu.pipeline_mode<synchronous>, transform_indices = @transform_6, window_bounds = array<i64: 1, 128>}, {transform_indices = @transform_7, window_bounds = array<i64: 32, 128>}]} {
    %c0 = arith.constant 0 : index
    %c0_0 = arith.constant 0 : index
    %0 = vector.load %arg2[%c0, %c0_0] : memref<4x128xf32, #tpu.memory_space<vmem>>, vector<4x128xf32>
    %c0_1 = arith.constant 0 : index
    %c0_2 = arith.constant 0 : index
    %1 = vector.load %arg3[%c0_1, %c0_2] : memref<1x128xf32, #tpu.memory_space<vmem>>, vector<1x128xf32>
    %c0_3 = arith.constant 0 : index
    %c0_4 = arith.constant 0 : index
    %2 = vector.load %arg6[%c0_3, %c0_4] : memref<128x128xf32, #tpu.memory_space<vmem>>, vector<128x128xf32>
    %c0_5 = arith.constant 0 : index
    %c0_6 = arith.constant 0 : index
    %3 = vector.load %arg7[%c0_5, %c0_6] : memref<1x128xf32, #tpu.memory_space<vmem>>, vector<1x128xf32>
    %c0_7 = arith.constant 0 : index
    %c0_8 = arith.constant 0 : index
    %4 = vector.load %arg1[%c0_7, %c0_8] : memref<32x4xf32, #tpu.memory_space<vmem>>, vector<32x4xf32>
    %cst = arith.constant dense<0.000000e+00> : vector<32x128xf32>
    %5 = tpu.matmul %4, %0, %cst {dimension_numbers = #tpu.dot_dimension_numbers<[1], [0], [0], [1], [0, 0, 1, 1], [], []>} : vector<32x4xf32>, vector<4x128xf32>, vector<32x128xf32> -> vector<32x128xf32>
    %6 = vector.broadcast %1 : vector<1x128xf32> to vector<32x128xf32>
    %7 = arith.addf %5, %6 : vector<32x128xf32>
    %8 = math.tanh %7 : vector<32x128xf32>
    %c0_9 = arith.constant 0 : index
    %c0_10 = arith.constant 0 : index
    %c0_11 = arith.constant 0 : index
    %9 = vector.load %arg4[%c0_9, %c0_10, %c0_11] : memref<2x128x128xf32, #tpu.memory_space<vmem>>, vector<1x128x128xf32>
    %10 = vector.shape_cast %9 : vector<1x128x128xf32> to vector<128x128xf32>
    %cst_12 = arith.constant dense<0.000000e+00> : vector<32x128xf32>
    %11 = tpu.matmul %8, %10, %cst_12 {dimension_numbers = #tpu.dot_dimension_numbers<[1], [0], [0], [1], [0, 0, 1, 1], [], []>} : vector<32x128xf32>, vector<128x128xf32>, vector<32x128xf32> -> vector<32x128xf32>
    %c0_13 = arith.constant 0 : index
    %c0_14 = arith.constant 0 : index
    %c0_15 = arith.constant 0 : index
    %12 = vector.load %arg5[%c0_13, %c0_14, %c0_15] : memref<2x1x128xf32, #tpu.memory_space<vmem>>, vector<1x1x128xf32>
    %13 = vector.shape_cast %12 : vector<1x1x128xf32> to vector<1x128xf32>
    %14 = vector.broadcast %13 : vector<1x128xf32> to vector<32x128xf32>
    %15 = arith.addf %11, %14 : vector<32x128xf32>
    %16 = math.tanh %15 : vector<32x128xf32>
    %c1 = arith.constant 1 : index
    %c0_16 = arith.constant 0 : index
    %c0_17 = arith.constant 0 : index
    %17 = vector.load %arg4[%c1, %c0_16, %c0_17] : memref<2x128x128xf32, #tpu.memory_space<vmem>>, vector<1x128x128xf32>
    %18 = vector.shape_cast %17 : vector<1x128x128xf32> to vector<128x128xf32>
    %cst_18 = arith.constant dense<0.000000e+00> : vector<32x128xf32>
    %19 = tpu.matmul %16, %18, %cst_18 {dimension_numbers = #tpu.dot_dimension_numbers<[1], [0], [0], [1], [0, 0, 1, 1], [], []>} : vector<32x128xf32>, vector<128x128xf32>, vector<32x128xf32> -> vector<32x128xf32>
    %c1_19 = arith.constant 1 : index
    %c0_20 = arith.constant 0 : index
    %c0_21 = arith.constant 0 : index
    %20 = vector.load %arg5[%c1_19, %c0_20, %c0_21] : memref<2x1x128xf32, #tpu.memory_space<vmem>>, vector<1x1x128xf32>
    %21 = vector.shape_cast %20 : vector<1x1x128xf32> to vector<1x128xf32>
    %22 = vector.broadcast %21 : vector<1x128xf32> to vector<32x128xf32>
    %23 = arith.addf %19, %22 : vector<32x128xf32>
    %24 = math.tanh %23 : vector<32x128xf32>
    %c0_22 = arith.constant 0 : index
    %c0_23 = arith.constant 0 : index
    %c0_24 = arith.constant 0 : index
    %25 = vector.load %arg4[%c0_22, %c0_23, %c0_24] : memref<2x128x128xf32, #tpu.memory_space<vmem>>, vector<1x128x128xf32>
    %26 = vector.shape_cast %25 : vector<1x128x128xf32> to vector<128x128xf32>
    %cst_25 = arith.constant dense<0.000000e+00> : vector<32x128xf32>
    %27 = tpu.matmul %24, %26, %cst_25 {dimension_numbers = #tpu.dot_dimension_numbers<[1], [0], [0], [1], [0, 0, 1, 1], [], []>} : vector<32x128xf32>, vector<128x128xf32>, vector<32x128xf32> -> vector<32x128xf32>
    %c0_26 = arith.constant 0 : index
    %c0_27 = arith.constant 0 : index
    %c0_28 = arith.constant 0 : index
    %28 = vector.load %arg5[%c0_26, %c0_27, %c0_28] : memref<2x1x128xf32, #tpu.memory_space<vmem>>, vector<1x1x128xf32>
    %29 = vector.shape_cast %28 : vector<1x1x128xf32> to vector<1x128xf32>
    %30 = vector.broadcast %29 : vector<1x128xf32> to vector<32x128xf32>
    %31 = arith.addf %27, %30 : vector<32x128xf32>
    %32 = math.tanh %31 : vector<32x128xf32>
    %c1_29 = arith.constant 1 : index
    %c0_30 = arith.constant 0 : index
    %c0_31 = arith.constant 0 : index
    %33 = vector.load %arg4[%c1_29, %c0_30, %c0_31] : memref<2x128x128xf32, #tpu.memory_space<vmem>>, vector<1x128x128xf32>
    %34 = vector.shape_cast %33 : vector<1x128x128xf32> to vector<128x128xf32>
    %cst_32 = arith.constant dense<0.000000e+00> : vector<32x128xf32>
    %35 = tpu.matmul %32, %34, %cst_32 {dimension_numbers = #tpu.dot_dimension_numbers<[1], [0], [0], [1], [0, 0, 1, 1], [], []>} : vector<32x128xf32>, vector<128x128xf32>, vector<32x128xf32> -> vector<32x128xf32>
    %c1_33 = arith.constant 1 : index
    %c0_34 = arith.constant 0 : index
    %c0_35 = arith.constant 0 : index
    %36 = vector.load %arg5[%c1_33, %c0_34, %c0_35] : memref<2x1x128xf32, #tpu.memory_space<vmem>>, vector<1x1x128xf32>
    %37 = vector.shape_cast %36 : vector<1x1x128xf32> to vector<1x128xf32>
    %38 = vector.broadcast %37 : vector<1x128xf32> to vector<32x128xf32>
    %39 = arith.addf %35, %38 : vector<32x128xf32>
    %40 = math.tanh %39 : vector<32x128xf32>
    %c0_36 = arith.constant 0 : index
    %c0_37 = arith.constant 0 : index
    %c0_38 = arith.constant 0 : index
    %41 = vector.load %arg4[%c0_36, %c0_37, %c0_38] : memref<2x128x128xf32, #tpu.memory_space<vmem>>, vector<1x128x128xf32>
    %42 = vector.shape_cast %41 : vector<1x128x128xf32> to vector<128x128xf32>
    %cst_39 = arith.constant dense<0.000000e+00> : vector<32x128xf32>
    %43 = tpu.matmul %40, %42, %cst_39 {dimension_numbers = #tpu.dot_dimension_numbers<[1], [0], [0], [1], [0, 0, 1, 1], [], []>} : vector<32x128xf32>, vector<128x128xf32>, vector<32x128xf32> -> vector<32x128xf32>
    %c0_40 = arith.constant 0 : index
    %c0_41 = arith.constant 0 : index
    %c0_42 = arith.constant 0 : index
    %44 = vector.load %arg5[%c0_40, %c0_41, %c0_42] : memref<2x1x128xf32, #tpu.memory_space<vmem>>, vector<1x1x128xf32>
    %45 = vector.shape_cast %44 : vector<1x1x128xf32> to vector<1x128xf32>
    %46 = vector.broadcast %45 : vector<1x128xf32> to vector<32x128xf32>
    %47 = arith.addf %43, %46 : vector<32x128xf32>
    %48 = math.tanh %47 : vector<32x128xf32>
    %c1_43 = arith.constant 1 : index
    %c0_44 = arith.constant 0 : index
    %c0_45 = arith.constant 0 : index
    %49 = vector.load %arg4[%c1_43, %c0_44, %c0_45] : memref<2x128x128xf32, #tpu.memory_space<vmem>>, vector<1x128x128xf32>
    %50 = vector.shape_cast %49 : vector<1x128x128xf32> to vector<128x128xf32>
    %cst_46 = arith.constant dense<0.000000e+00> : vector<32x128xf32>
    %51 = tpu.matmul %48, %50, %cst_46 {dimension_numbers = #tpu.dot_dimension_numbers<[1], [0], [0], [1], [0, 0, 1, 1], [], []>} : vector<32x128xf32>, vector<128x128xf32>, vector<32x128xf32> -> vector<32x128xf32>
    %c1_47 = arith.constant 1 : index
    %c0_48 = arith.constant 0 : index
    %c0_49 = arith.constant 0 : index
    %52 = vector.load %arg5[%c1_47, %c0_48, %c0_49] : memref<2x1x128xf32, #tpu.memory_space<vmem>>, vector<1x1x128xf32>
    %53 = vector.shape_cast %52 : vector<1x1x128xf32> to vector<1x128xf32>
    %54 = vector.broadcast %53 : vector<1x128xf32> to vector<32x128xf32>
    %55 = arith.addf %51, %54 : vector<32x128xf32>
    %56 = math.tanh %55 : vector<32x128xf32>
    %cst_50 = arith.constant dense<0.000000e+00> : vector<32x128xf32>
    %57 = tpu.matmul %56, %2, %cst_50 {dimension_numbers = #tpu.dot_dimension_numbers<[1], [0], [0], [1], [0, 0, 1, 1], [], []>} : vector<32x128xf32>, vector<128x128xf32>, vector<32x128xf32> -> vector<32x128xf32>
    %58 = vector.broadcast %3 : vector<1x128xf32> to vector<32x128xf32>
    %59 = arith.addf %57, %58 : vector<32x128xf32>
    %c0_51 = arith.constant 0 : index
    %c0_52 = arith.constant 0 : index
    %60 = vector.load %arg8[%c0_51, %c0_52] : memref<32x128xf32, #tpu.memory_space<vmem>>, vector<32x128xf32>
    tpu.vector_store %arg8[%c0_51, %c0_52], %59 {strides = array<i32>} : memref<32x128xf32, #tpu.memory_space<vmem>>, vector<32x128xf32>,
    return
  }
  func.func @transform_0(%arg0: i32) -> (i32, i32) {
    %c0_i32 = arith.constant 0 : i32
    %c0_i32_0 = arith.constant 0 : i32
    return %arg0, %c0_i32 : i32, i32
  }
  func.func @transform_1(%arg0: i32) -> (i32, i32) {
    %c0_i32 = arith.constant 0 : i32
    %c0_i32_0 = arith.constant 0 : i32
    %c0_i32_1 = arith.constant 0 : i32
    return %c0_i32, %c0_i32_0 : i32, i32
  }
  func.func @transform_2(%arg0: i32) -> (i32, i32) {
    %c0_i32 = arith.constant 0 : i32
    %c0_i32_0 = arith.constant 0 : i32
    %c0_i32_1 = arith.constant 0 : i32
    return %c0_i32, %c0_i32_0 : i32, i32
  }
  func.func @transform_3(%arg0: i32) -> (i32, i32, i32) {
    %c0_i32 = arith.constant 0 : i32
    %c0_i32_0 = arith.constant 0 : i32
    %c0_i32_1 = arith.constant 0 : i32
    %c0_i32_2 = arith.constant 0 : i32
    return %c0_i32, %c0_i32_0, %c0_i32_1 : i32, i32, i32
  }
  func.func @transform_4(%arg0: i32) -> (i32, i32, i32) {
    %c0_i32 = arith.constant 0 : i32
    %c0_i32_0 = arith.constant 0 : i32
    %c0_i32_1 = arith.constant 0 : i32
    %c0_i32_2 = arith.constant 0 : i32
    return %c0_i32, %c0_i32_0, %c0_i32_1 : i32, i32, i32
  }
  func.func @transform_5(%arg0: i32) -> (i32, i32) {
    %c0_i32 = arith.constant 0 : i32
    %c0_i32_0 = arith.constant 0 : i32
    %c0_i32_1 = arith.constant 0 : i32
    return %c0_i32, %c0_i32_0 : i32, i32
  }
  func.func @transform_6(%arg0: i32) -> (i32, i32) {
    %c0_i32 = arith.constant 0 : i32
    %c0_i32_0 = arith.constant 0 : i32
    %c0_i32_1 = arith.constant 0 : i32
    return %c0_i32, %c0_i32_0 : i32, i32
  }
  func.func @transform_7(%arg0: i32) -> (i32, i32) {
    %c0_i32 = arith.constant 0 : i32
    %c0_i32_0 = arith.constant 0 : i32
    return %arg0, %c0_i32 : i32, i32
  }
}

</mosaic_0001>

<bundles_post_ra>
// kernel: tpu_custom_call.1
= control target key start
LH: loop header
LB: loop body
LE: loop exit
PB: predicated region body
PF: predicated region fallthrough
CT: control target
= control target key end

     0   :  { %12 = vsyncpa [#allocation3], 0  ;;  %s1851_s0 = inlined_call_operand.vmem [shape: f32[32,4], index: 0, kind: input, shape index: {}]   ;;  %s1852_s1 = inlined_call_operand.vmem [shape: f32[4,128], index: 1, kind: input, shape index: {}]   ;;  %s1853_s2 = inlined_call_operand.vmem [shape: f32[1,128], index: 2, kind: input, shape index: {}]   ;;  %s1854_s3 = inlined_call_operand.hbm [shape: f32[2,128,128], index: 3, kind: input, shape index: {}]   ;;  %s1855_s4 = inlined_call_operand.vmem [shape: f32[2,1,128], index: 4, kind: input, shape index: {}]   ;;  %s1856_s5 = inlined_call_operand.hbm [shape: f32[128,128], index: 5, kind: input, shape index: {}]   ;;  %s1857_s6 = inlined_call_operand.vmem [shape: f32[1,128], index: 6, kind: input, shape index: {}]   ;;  %s1858_s7 = inlined_call_operand.hbm [shape: f32[32,128], index: 7, kind: output, shape index: {}]  }
   0x1   :  { %13 = vsyncpa [#allocation6], 0 }
   0x2   :  { %14 = vsyncpa [#allocation4], 0  ;;  %s1473_s24 = smov [#allocation2]  }
   0x3   :  { %s26_s25 = sshll.u32 %s1473_s24, 4  ;;  %s27_s25 = int_to_ptr.vmem [resolvable:$true] %s26_s25 }
   0x4   :  { %s1415_s26 = scalar_lea.vmem %s27_s25, 4096  ;;  %p1420_p1 = scmp.lt.s32.totalorder %s27_s25, %s27_s25 }
   0x5   :  { %p1416_p0 = scmp.ne.s32.totalorder %s27_s25, %s1415_s26  ;;  %p1421_p2 = scmp.lt.s32.totalorder %s1415_s26, %s1415_s26 }
   0x7   :  { %p1422_p3 = por %p1421_p2, %p1420_p1 }
   0x9   :  { %p1423_p4 = pnand %p1422_p3, %p1416_p0 }
   0xb   :  { %1426 = shalt.err (!%p1423_p4)
}
   0xc   :  { %s1474_s27 = smov 128   ;;  %s1475_s28 = smov 8  }
   0xd   :  { %32 = dma.hbm_to_vmem [thread:$0]  %s1854_s3, 4096, %s27_s25, [#allocation3], %s1474_s27, %s1474_s27, %s1475_s28  }
   0xe   :  { %s1476_s8 = smov [#allocation5]  }
   0xf   :  { %s40_s9 = sshll.u32 %s1476_s8, 4  ;;  %s41_s9 = int_to_ptr.vmem [resolvable:$true] %s40_s9 }
  0x10   :  { %s1435_s10 = scalar_lea.vmem %s41_s9, 2048  ;;  %p1440_p6 = scmp.lt.s32.totalorder %s41_s9, %s41_s9 }
  0x11   :  { %p1436_p5 = scmp.ne.s32.totalorder %s41_s9, %s1435_s10  ;;  %p1441_p7 = scmp.lt.s32.totalorder %s1435_s10, %s1435_s10 }
  0x13   :  { %p1442_p8 = por %p1441_p7, %p1440_p6 }
  0x15   :  { %p1443_p9 = pnand %p1442_p8, %p1436_p5 }
  0x17   :  { %1446 = shalt.err (!%p1443_p9)
}
  0x18   :  { %46 = dma.hbm_to_vmem [thread:$0]  %s1856_s5, 2048, %s41_s9, [#allocation6], %s1474_s27, %s1474_s27, %s1475_s28  }
  0x19   :  { %1467 = dma.done.wait [#allocation3], 4096  }
  0x1a   :  { %1468 = vsyncadd [#allocation3], 4294963200 }
  0x1b   :  { %1469 = dma.done.wait [#allocation6], 2048  }
  0x1c   :  { %1470 = vsyncadd [#allocation6], 4294965248  ;;  %vm97_vm0 = vcmask 1043456   ;;  %vm84_vm1 = vcmask 31744   ;;  %v55_v0 = vld [vmem:[%s1852_s1] sm:$0xf] }
  0x1d   :  { %v74_v1 = vld [vmem:[%s1851_s0] sm:$0xff]  ;;  %v75_v2 = vld [vmem:[%s1851_s0 + $0x8] sm:$0xff]  ;;  %1040 = vmatprep.subr.msk.mxu0 %vm97_vm0, %v55_v0  ;;  %v76_v3 = vld [vmem:[%s1851_s0 + $0x10] sm:$0xff]  ;;  %s1477_s25 = smov [#allocation7]  }
  0x1e   :  { %1042 = vmatprep.mubr.msk.f32.mxu0 %vm84_vm1, %v74_v1  ;;  %v1543_v4 = vld [vmem:[#allocation2 + $0x78] sm:$0xff]  ;;  %1041 = vmatpush3.msk.msra.mxu0 %vm97_vm0, %v55_v0  ;;  %v1546_v5 = vld [vmem:[#allocation2 + $0x70] sm:$0xff]  ;;  %v1550_v6 = vld [vmem:[#allocation2 + $0x68] sm:$0xff]  ;;  %s872_s26 = sshll.u32 %s1477_s25, 4  ;;  %s873_s26 = int_to_ptr.vmem [resolvable:$true] %s872_s26 }
  0x1f   :  { %1048 = vmatprep.subr.mxu1 %v1543_v4  ;;  %1043 = vmatmul.mubr.msk.f32.vlgmr.msra.gmra.mxu0 %vm84_vm1, %v75_v2  ;;  %v77_v7 = vld [vmem:[%s1851_s0 + $0x18] sm:$0xff]  ;;  %v1558_v8 = vld [vmem:[#allocation2 + $0x60] sm:$0xff]  ;;  %v1567_v10 = vld [vmem:[#allocation2 + $0x50] sm:$0xff]  ;;  %s1447_s29 = scalar_lea.vmem %s873_s26, 512  ;;  %p1452_p11 = scmp.lt.s32.totalorder %s873_s26, %s873_s26 }
  0x20   :  { %1049 = vmatpush3.msra.mxu1 %v1543_v4  ;;  %1045 = vmatprep.mubr.msk.f32.mxu0 %vm84_vm1, %v76_v3  ;;  %v1563_v9 = vld [vmem:[#allocation2 + $0x58] sm:$0xff]  ;;  %v1573_v11 = vld [vmem:[#allocation2 + $0x48] sm:$0xff]  ;;  %v1577_v12 = vld [vmem:[#allocation2 + $0x40] sm:$0xff]  ;;  %p1448_p10 = scmp.ne.s32.totalorder %s873_s26, %s1447_s29  ;;  %p1453_p12 = scmp.lt.s32.totalorder %s1447_s29, %s1447_s29 }
  0x21   :  { %1050 = vmatprep.subr.mxu1 %v1546_v5  ;;  %v1581_v13 = vld [vmem:[#allocation2 + $0x38] sm:$0xff]  ;;  %v1585_v14 = vld [vmem:[#allocation2 + $0x30] sm:$0xff]  ;;  %v1589_v15 = vld [vmem:[#allocation2 + $0x28] sm:$0xff] }
  0x22   :  { %1051 = vmatpush3.msra.mxu1 %v1546_v5  ;;  %v1593_v16 = vld [vmem:[#allocation2 + $0x20] sm:$0xff]  ;;  %v1595_v17 = vld [vmem:[#allocation2 + $0x18] sm:$0xff]  ;;  %v1599_v18 = vld [vmem:[#allocation2 + $0x10] sm:$0xff]  ;;  %p1454_p13 = por %p1453_p12, %p1452_p11 }
  0x23   :  { %1052 = vmatprep.subr.mxu1 %v1550_v6  ;;  %1046 = vmatmul.mubr.msk.f32.gmra.mxu0 %vm84_vm1, %v77_v7  ;;  %v1603_v19 = vld [vmem:[#allocation2 + $0x8] sm:$0xff]  ;;  %v1607_v20 = vld [vmem:[#allocation2] sm:$0xff]  ;;  %v1614_v21 = vld [vmem:[#allocation2 + $0xf8] sm:$0xff] }
  0x24   :  { %1053 = vmatpush3.msra.mxu1 %v1550_v6  ;;  %v1616_v22 = vld [vmem:[#allocation2 + $0xf0] sm:$0xff]  ;;  %1086 = vmatprep.subr.mxu0 %v1614_v21  ;;  %v1620_v23 = vld [vmem:[#allocation2 + $0xe8] sm:$0xff]  ;;  %v1624_v24 = vld [vmem:[#allocation2 + $0xe0] sm:$0xff]  ;;  %p1455_p0 = pnand %p1454_p13, %p1448_p10 }
  0x25   :  { %1054 = vmatprep.subr.mxu1 %v1558_v8  ;;  %1087 = vmatpush3.msra.mxu0 %v1614_v21  ;;  %v1628_v25 = vld [vmem:[#allocation2 + $0xd8] sm:$0xff]  ;;  %v1632_v26 = vld [vmem:[#allocation2 + $0xd0] sm:$0xff]  ;;  %v885_v27 = vld [vmem:[%s1853_s2] ss:$0 sm:$0xff] }
  0x26   :  { %1055 = vmatpush3.msra.mxu1 %v1558_v8  ;;  %1088 = vmatprep.subr.mxu0 %v1616_v22  ;;  %v1673_v40 = vld [vmem:[#allocation2 + $0xc8] sm:$0xff]  ;;  %v1677_v41 = vld [vmem:[#allocation2 + $0xc0] sm:$0xff]  ;;  %v1681_v42 = vld [vmem:[#allocation2 + $0xb8] sm:$0xff] }
  0x27   :  { %1056 = vmatprep.subr.mxu1 %v1563_v9  ;;  %1089 = vmatpush3.msra.mxu0 %v1616_v22  ;;  %v1685_v43 = vld [vmem:[#allocation2 + $0xb0] sm:$0xff]  ;;  %v1689_v44 = vld [vmem:[#allocation2 + $0xa8] sm:$0xff]  ;;  %v1693_v45 = vld [vmem:[#allocation2 + $0xa0] sm:$0xff] }
  0x28   :  { %1057 = vmatpush3.msra.mxu1 %v1563_v9  ;;  %1090 = vmatprep.subr.mxu0 %v1620_v23  ;;  %v1695_v46 = vld [vmem:[#allocation2 + $0x98] sm:$0xff]  ;;  %v1699_v47 = vld [vmem:[#allocation2 + $0x90] sm:$0xff]  ;;  %v1703_v48 = vld [vmem:[#allocation2 + $0x88] sm:$0xff] }
  0x29   :  { %1058 = vmatprep.subr.mxu1 %v1567_v10  ;;  %1091 = vmatpush3.msra.mxu0 %v1620_v23  ;;  %v1707_v49 = vld [vmem:[#allocation2 + $0x80] sm:$0xff] }
  0x2a   :  { %1059 = vmatpush3.msra.mxu1 %v1567_v10  ;;  %1092 = vmatprep.subr.mxu0 %v1624_v24  ;;  %v1717_v50 = vld [vmem:[%s1855_s4] ss:$0 sm:$0xff]  ;;  %v1758_v63 = vld [vmem:[%s1855_s4 + $0x1] ss:$0 sm:$0xff] }
  0x2b   :  { %1060 = vmatprep.subr.mxu1 %v1573_v11  ;;  %1093 = vmatpush3.msra.mxu0 %v1624_v24 }
  0x2c   :  { %1061 = vmatpush3.msra.mxu1 %v1573_v11  ;;  %1094 = vmatprep.subr.mxu0 %v1628_v25 }
  0x2d   :  { %1062 = vmatprep.subr.mxu1 %v1577_v12  ;;  %1095 = vmatpush3.msra.mxu0 %v1628_v25 }
  0x2e   :  { %1063 = vmatpush3.msra.mxu1 %v1577_v12  ;;  %1096 = vmatprep.subr.mxu0 %v1632_v26 }
  0x2f   :  { %1064 = vmatprep.subr.mxu1 %v1581_v13  ;;  %1097 = vmatpush3.msra.mxu0 %v1632_v26 }
  0x30   :  { %1065 = vmatpush3.msra.mxu1 %v1581_v13  ;;  %1098 = vmatprep.subr.mxu0 %v1673_v40 }
  0x31   :  { %1066 = vmatprep.subr.mxu1 %v1585_v14  ;;  %1099 = vmatpush3.msra.mxu0 %v1673_v40 }
  0x32   :  { %1067 = vmatpush3.msra.mxu1 %v1585_v14  ;;  %1100 = vmatprep.subr.mxu0 %v1677_v41 }
  0x33   :  { %1068 = vmatprep.subr.mxu1 %v1589_v15  ;;  %1101 = vmatpush3.msra.mxu0 %v1677_v41 }
  0x34   :  { %1069 = vmatpush3.msra.mxu1 %v1589_v15  ;;  %1102 = vmatprep.subr.mxu0 %v1681_v42 }
  0x35   :  { %1070 = vmatprep.subr.mxu1 %v1593_v16  ;;  %1103 = vmatpush3.msra.mxu0 %v1681_v42 }
  0x36   :  { %1071 = vmatpush3.msra.mxu1 %v1593_v16  ;;  %1104 = vmatprep.subr.mxu0 %v1685_v43 }
  0x37   :  { %1072 = vmatprep.subr.mxu1 %v1595_v17  ;;  %1105 = vmatpush3.msra.mxu0 %v1685_v43 }
  0x38   :  { %1073 = vmatpush3.msra.mxu1 %v1595_v17  ;;  %1106 = vmatprep.subr.mxu0 %v1689_v44 }
  0x39   :  { %1074 = vmatprep.subr.mxu1 %v1599_v18  ;;  %1107 = vmatpush3.msra.mxu0 %v1689_v44 }
  0x3a   :  { %1075 = vmatpush3.msra.mxu1 %v1599_v18  ;;  %1108 = vmatprep.subr.mxu0 %v1693_v45 }
  0x3b   :  { %1076 = vmatprep.subr.mxu1 %v1603_v19  ;;  %1109 = vmatpush3.msra.mxu0 %v1693_v45 }
  0x3c   :  { %1077 = vmatpush3.msra.mxu1 %v1603_v19  ;;  %1110 = vmatprep.subr.mxu0 %v1695_v46 }
  0x3d   :  { %1078 = vmatprep.subr.mxu1 %v1607_v20  ;;  %1111 = vmatpush3.msra.mxu0 %v1695_v46 }
  0x3e   :  { %1079 = vmatpush3.msra.mxu1 %v1607_v20  ;;  %1112 = vmatprep.subr.mxu0 %v1699_v47 }
  0x3f   :  { %1124 = vmatprep.subr.mxu1 %v1543_v4  ;;  %1113 = vmatpush3.msra.mxu0 %v1699_v47 }
  0x40   :  { %1114 = vmatprep.subr.mxu0 %v1703_v48 }
  0x41   :  { %1115 = vmatpush3.msra.mxu0 %v1703_v48 }
  0x42   :  { %1116 = vmatprep.subr.mxu0 %v1707_v49 }
  0x43   :  { %1117 = vmatpush3.msra.mxu0 %v1707_v49 }
  0x44   :  { %1162 = vmatprep.subr.mxu0 %v1614_v21 }
  0xdf   :  { %v1044_v28 = vpop.f32.mrf.mxu0 }
  0xe0   :  { %v173_v29 = vadd.f32 %v1044_v28, %v885_v27 }
  0xe1   :  { %v167_v30 = vpop.f32.mrf.mxu0 }
  0xe2   :  { %v168_v31 = vadd.f32 %v885_v27, %v167_v30 }
  0xe3   :  { %v1047_v32 = vpop.f32.mrf.mxu0 }
  0xe4   :  { %1351 = vtanh.f32 %v168_v31  ;;  %v183_v33 = vadd.f32 %v1047_v32, %v885_v27 }
  0xe5   :  { %1353 = vtanh.f32 %v173_v29  ;;  %v177_v34 = vpop.f32.mrf.mxu0 }
  0xe6   :  { %v178_v35 = vadd.f32 %v885_v27, %v177_v34 }
  0xe8   :  { %1355 = vtanh.f32 %v178_v35 }
  0xe9   :  { %1357 = vtanh.f32 %v183_v33 }
  0xf1   :  { %v1352_v36 = vpop.eup %1351 }
  0xf2   :  { %v1354_v37 = vpop.eup %1353  ;;  %1080 = vmatprep.mubr.f32.mxu1 %v1352_v36  ;;  %v72_v36 = vld [vmem:[#allocation5 + $0x78] sm:$0xff] }
  0xf3   :  { %1081 = vmatmul.mubr.f32.vlgmr.msra.gmra.mxu1 %v1354_v37  ;;  %v71_v37 = vld [vmem:[#allocation5 + $0x70] sm:$0xff] }
  0xf4   :  { %1125 = vmatpush3.msra.mxu1 %v1543_v4 }
  0xf5   :  { %v1356_v38 = vpop.eup %1355  ;;  %1126 = vmatprep.subr.mxu1 %v1546_v5 }
  0xf6   :  { %v1358_v39 = vpop.eup %1357  ;;  %1083 = vmatprep.mubr.f32.mxu1 %v1356_v38  ;;  %1127 = vmatpush3.msra.mxu1 %v1546_v5  ;;  %v70_v38 = vld [vmem:[#allocation5 + $0x68] sm:$0xff] }
  0xf7   :  { %1084 = vmatmul.mubr.f32.gmra.mxu1 %v1358_v39  ;;  %1128 = vmatprep.subr.mxu1 %v1550_v6  ;;  %v69_v39 = vld [vmem:[#allocation5 + $0x60] sm:$0xff] }
  0xf8   :  { %1129 = vmatpush3.msra.mxu1 %v1550_v6 }
  0xf9   :  { %1130 = vmatprep.subr.mxu1 %v1558_v8 }
  0xfa   :  { %1131 = vmatpush3.msra.mxu1 %v1558_v8 }
  0xfb   :  { %1132 = vmatprep.subr.mxu1 %v1563_v9 }
  0xfc   :  { %1133 = vmatpush3.msra.mxu1 %v1563_v9 }
  0xfd   :  { %1134 = vmatprep.subr.mxu1 %v1567_v10 }
  0xfe   :  { %1135 = vmatpush3.msra.mxu1 %v1567_v10 }
  0xff   :  { %1136 = vmatprep.subr.mxu1 %v1573_v11 }
 0x100   :  { %1137 = vmatpush3.msra.mxu1 %v1573_v11 }
 0x101   :  { %1138 = vmatprep.subr.mxu1 %v1577_v12 }
 0x102   :  { %1139 = vmatpush3.msra.mxu1 %v1577_v12 }
 0x103   :  { %1140 = vmatprep.subr.mxu1 %v1581_v13 }
 0x104   :  { %1141 = vmatpush3.msra.mxu1 %v1581_v13 }
 0x105   :  { %1142 = vmatprep.subr.mxu1 %v1585_v14 }
 0x106   :  { %1143 = vmatpush3.msra.mxu1 %v1585_v14 }
 0x107   :  { %1144 = vmatprep.subr.mxu1 %v1589_v15 }
 0x108   :  { %1145 = vmatpush3.msra.mxu1 %v1589_v15 }
 0x109   :  { %1146 = vmatprep.subr.mxu1 %v1593_v16 }
 0x10a   :  { %1147 = vmatpush3.msra.mxu1 %v1593_v16 }
 0x10b   :  { %1148 = vmatprep.subr.mxu1 %v1595_v17 }
 0x10c   :  { %1149 = vmatpush3.msra.mxu1 %v1595_v17 }
 0x10d   :  { %1150 = vmatprep.subr.mxu1 %v1599_v18 }
 0x10e   :  { %1151 = vmatpush3.msra.mxu1 %v1599_v18 }
 0x10f   :  { %1152 = vmatprep.subr.mxu1 %v1603_v19 }
 0x110   :  { %1153 = vmatpush3.msra.mxu1 %v1603_v19 }
 0x111   :  { %1154 = vmatprep.subr.mxu1 %v1607_v20 }
 0x112   :  { %1155 = vmatpush3.msra.mxu1 %v1607_v20 }
 0x113   :  { %1200 = vmatprep.subr.mxu1 %v1543_v4 }
 0x1b3   :  { %v1082_v51 = vpop.f32.mrf.mxu1 }
 0x1b4   :  { %v285_v52 = vadd.f32 %v1082_v51, %v1717_v50 }
 0x1b5   :  { %v279_v53 = vpop.f32.mrf.mxu1 }
 0x1b6   :  { %v280_v54 = vadd.f32 %v1717_v50, %v279_v53 }
 0x1b7   :  { %v1085_v55 = vpop.f32.mrf.mxu1 }
 0x1b8   :  { %1359 = vtanh.f32 %v280_v54  ;;  %v295_v56 = vadd.f32 %v1085_v55, %v1717_v50  ;;  %v65_v55 = vld [vmem:[#allocation5 + $0x40] sm:$0xff] }
 0x1b9   :  { %1361 = vtanh.f32 %v285_v52  ;;  %v289_v57 = vpop.f32.mrf.mxu1 }
 0x1ba   :  { %v290_v58 = vadd.f32 %v1717_v50, %v289_v57  ;;  %v63_v57 = vld [vmem:[#allocation5 + $0x30] sm:$0xff] }
 0x1bc   :  { %1363 = vtanh.f32 %v290_v58  ;;  %v62_v58 = vld [vmem:[#allocation5 + $0x28] sm:$0xff] }
 0x1bd   :  { %1365 = vtanh.f32 %v295_v56  ;;  %v64_v56 = vld [vmem:[#allocation5 + $0x38] sm:$0xff] }
 0x1c5   :  { %v1360_v59 = vpop.eup %1359 }
 0x1c6   :  { %v1362_v60 = vpop.eup %1361  ;;  %1118 = vmatprep.mubr.f32.mxu0 %v1360_v59  ;;  %v61_v59 = vld [vmem:[#allocation5 + $0x20] sm:$0xff] }
 0x1c7   :  { %1119 = vmatmul.mubr.f32.vlgmr.msra.gmra.mxu0 %v1362_v60  ;;  %v60_v60 = vld [vmem:[#allocation5 + $0x18] sm:$0xff] }
 0x1c8   :  { %1163 = vmatpush3.msra.mxu0 %v1614_v21 }
 0x1c9   :  { %v1364_v61 = vpop.eup %1363  ;;  %1164 = vmatprep.subr.mxu0 %v1616_v22 }
 0x1ca   :  { %v1366_v62 = vpop.eup %1365  ;;  %1121 = vmatprep.mubr.f32.mxu0 %v1364_v61  ;;  %1165 = vmatpush3.msra.mxu0 %v1616_v22  ;;  %v59_v61 = vld [vmem:[#allocation5 + $0x10] sm:$0xff] }
 0x1cb   :  { %1122 = vmatmul.mubr.f32.gmra.mxu0 %v1366_v62  ;;  %1166 = vmatprep.subr.mxu0 %v1620_v23  ;;  %v58_v62 = vld [vmem:[#allocation5 + $0x8] sm:$0xff] }
 0x1cc   :  { %1167 = vmatpush3.msra.mxu0 %v1620_v23 }
 0x1cd   :  { %1168 = vmatprep.subr.mxu0 %v1624_v24 }
 0x1ce   :  { %1169 = vmatpush3.msra.mxu0 %v1624_v24 }
 0x1cf   :  { %1170 = vmatprep.subr.mxu0 %v1628_v25 }
 0x1d0   :  { %1171 = vmatpush3.msra.mxu0 %v1628_v25 }
 0x1d1   :  { %1172 = vmatprep.subr.mxu0 %v1632_v26 }
 0x1d2   :  { %1173 = vmatpush3.msra.mxu0 %v1632_v26 }
 0x1d3   :  { %1174 = vmatprep.subr.mxu0 %v1673_v40 }
 0x1d4   :  { %1175 = vmatpush3.msra.mxu0 %v1673_v40 }
 0x1d5   :  { %1176 = vmatprep.subr.mxu0 %v1677_v41 }
 0x1d6   :  { %1177 = vmatpush3.msra.mxu0 %v1677_v41 }
 0x1d7   :  { %1178 = vmatprep.subr.mxu0 %v1681_v42 }
 0x1d8   :  { %1179 = vmatpush3.msra.mxu0 %v1681_v42 }
 0x1d9   :  { %1180 = vmatprep.subr.mxu0 %v1685_v43 }
 0x1da   :  { %1181 = vmatpush3.msra.mxu0 %v1685_v43 }
 0x1db   :  { %1182 = vmatprep.subr.mxu0 %v1689_v44 }
 0x1dc   :  { %1183 = vmatpush3.msra.mxu0 %v1689_v44 }
 0x1dd   :  { %1184 = vmatprep.subr.mxu0 %v1693_v45 }
 0x1de   :  { %1185 = vmatpush3.msra.mxu0 %v1693_v45 }
 0x1df   :  { %1186 = vmatprep.subr.mxu0 %v1695_v46 }
 0x1e0   :  { %1187 = vmatpush3.msra.mxu0 %v1695_v46 }
 0x1e1   :  { %1188 = vmatprep.subr.mxu0 %v1699_v47 }
 0x1e2   :  { %1189 = vmatpush3.msra.mxu0 %v1699_v47 }
 0x1e3   :  { %1190 = vmatprep.subr.mxu0 %v1703_v48 }
 0x1e4   :  { %1191 = vmatpush3.msra.mxu0 %v1703_v48 }
 0x1e5   :  { %1192 = vmatprep.subr.mxu0 %v1707_v49 }
 0x1e6   :  { %1193 = vmatpush3.msra.mxu0 %v1707_v49 }
 0x1e7   :  { %1238 = vmatprep.subr.mxu0 %v1614_v21 }
 0x287   :  { %v1120_v0 = vpop.f32.mrf.mxu0 }
 0x288   :  { %v399_v1 = vadd.f32 %v1120_v0, %v1758_v63  ;;  %v57_v0 = vld [vmem:[#allocation5] sm:$0xff] }
 0x289   :  { %v393_v2 = vpop.f32.mrf.mxu0 }
 0x28a   :  { %v394_v3 = vadd.f32 %v1758_v63, %v393_v2 }
 0x28b   :  { %v1123_v7 = vpop.f32.mrf.mxu0 }
 0x28c   :  { %1367 = vtanh.f32 %v394_v3  ;;  %v409_v27 = vadd.f32 %v1123_v7, %v1758_v63 }
 0x28d   :  { %1369 = vtanh.f32 %v399_v1  ;;  %v403_v28 = vpop.f32.mrf.mxu0 }
 0x28e   :  { %v404_v29 = vadd.f32 %v1758_v63, %v403_v28 }
 0x290   :  { %1371 = vtanh.f32 %v404_v29 }
 0x291   :  { %1373 = vtanh.f32 %v409_v27 }
 0x299   :  { %v1368_v30 = vpop.eup %1367 }
 0x29a   :  { %v1370_v31 = vpop.eup %1369  ;;  %1156 = vmatprep.mubr.f32.mxu1 %v1368_v30 }
 0x29b   :  { %1157 = vmatmul.mubr.f32.vlgmr.msra.gmra.mxu1 %v1370_v31 }
 0x29c   :  { %1201 = vmatpush3.msra.mxu1 %v1543_v4 }
 0x29d   :  { %v1372_v32 = vpop.eup %1371  ;;  %1202 = vmatprep.subr.mxu1 %v1546_v5 }
 0x29e   :  { %v1374_v33 = vpop.eup %1373  ;;  %1159 = vmatprep.mubr.f32.mxu1 %v1372_v32  ;;  %1203 = vmatpush3.msra.mxu1 %v1546_v5 }
 0x29f   :  { %1160 = vmatmul.mubr.f32.gmra.mxu1 %v1374_v33  ;;  %1204 = vmatprep.subr.mxu1 %v1550_v6 }
 0x2a0   :  { %1205 = vmatpush3.msra.mxu1 %v1550_v6 }
 0x2a1   :  { %1206 = vmatprep.subr.mxu1 %v1558_v8 }
 0x2a2   :  { %1207 = vmatpush3.msra.mxu1 %v1558_v8 }
 0x2a3   :  { %1208 = vmatprep.subr.mxu1 %v1563_v9 }
 0x2a4   :  { %1209 = vmatpush3.msra.mxu1 %v1563_v9 }
 0x2a5   :  { %1210 = vmatprep.subr.mxu1 %v1567_v10 }
 0x2a6   :  { %1211 = vmatpush3.msra.mxu1 %v1567_v10 }
 0x2a7   :  { %1212 = vmatprep.subr.mxu1 %v1573_v11 }
 0x2a8   :  { %1213 = vmatpush3.msra.mxu1 %v1573_v11 }
 0x2a9   :  { %1214 = vmatprep.subr.mxu1 %v1577_v12 }
 0x2aa   :  { %1215 = vmatpush3.msra.mxu1 %v1577_v12 }
 0x2ab   :  { %1216 = vmatprep.subr.mxu1 %v1581_v13 }
 0x2ac   :  { %1217 = vmatpush3.msra.mxu1 %v1581_v13 }
 0x2ad   :  { %1218 = vmatprep.subr.mxu1 %v1585_v14 }
 0x2ae   :  { %1219 = vmatpush3.msra.mxu1 %v1585_v14 }
 0x2af   :  { %1220 = vmatprep.subr.mxu1 %v1589_v15 }
 0x2b0   :  { %1221 = vmatpush3.msra.mxu1 %v1589_v15 }
 0x2b1   :  { %1222 = vmatprep.subr.mxu1 %v1593_v16 }
 0x2b2   :  { %1223 = vmatpush3.msra.mxu1 %v1593_v16 }
 0x2b3   :  { %1224 = vmatprep.subr.mxu1 %v1595_v17 }
 0x2b4   :  { %1225 = vmatpush3.msra.mxu1 %v1595_v17 }
 0x2b5   :  { %1226 = vmatprep.subr.mxu1 %v1599_v18 }
 0x2b6   :  { %1227 = vmatpush3.msra.mxu1 %v1599_v18 }
 0x2b7   :  { %1228 = vmatprep.subr.mxu1 %v1603_v19 }
 0x2b8   :  { %1229 = vmatpush3.msra.mxu1 %v1603_v19 }
 0x2b9   :  { %1230 = vmatprep.subr.mxu1 %v1607_v20 }
 0x2ba   :  { %1231 = vmatpush3.msra.mxu1 %v1607_v20 }
 0x2bb   :  { %1314 = vmatprep.subr.mxu1 %v72_v36 }
 0x35b   :  { %v1158_v4 = vpop.f32.mrf.mxu1 }
 0x35c   :  { %v488_v5 = vadd.f32 %v1158_v4, %v1717_v50 }
 0x35d   :  { %v482_v6 = vpop.f32.mrf.mxu1 }
 0x35e   :  { %v483_v8 = vadd.f32 %v1717_v50, %v482_v6 }
 0x35f   :  { %v1161_v9 = vpop.f32.mrf.mxu1 }
 0x360   :  { %1375 = vtanh.f32 %v483_v8  ;;  %v498_v10 = vadd.f32 %v1161_v9, %v1717_v50 }
 0x361   :  { %1377 = vtanh.f32 %v488_v5  ;;  %v492_v11 = vpop.f32.mrf.mxu1  ;;  %v894_v5 = vld [vmem:[%s1857_s6] ss:$0 sm:$0xff] }
 0x362   :  { %v493_v12 = vadd.f32 %v1717_v50, %v492_v11 }
 0x364   :  { %1379 = vtanh.f32 %v493_v12 }
 0x365   :  { %1381 = vtanh.f32 %v498_v10 }
 0x36d   :  { %v1376_v13 = vpop.eup %1375 }
 0x36e   :  { %v1378_v14 = vpop.eup %1377  ;;  %1194 = vmatprep.mubr.f32.mxu0 %v1376_v13 }
 0x36f   :  { %1195 = vmatmul.mubr.f32.vlgmr.msra.gmra.mxu0 %v1378_v14 }
 0x370   :  { %1239 = vmatpush3.msra.mxu0 %v1614_v21 }
 0x371   :  { %v1380_v15 = vpop.eup %1379  ;;  %1240 = vmatprep.subr.mxu0 %v1616_v22 }
 0x372   :  { %v1382_v16 = vpop.eup %1381  ;;  %1197 = vmatprep.mubr.f32.mxu0 %v1380_v15  ;;  %1241 = vmatpush3.msra.mxu0 %v1616_v22 }
 0x373   :  { %1198 = vmatmul.mubr.f32.gmra.mxu0 %v1382_v16  ;;  %1242 = vmatprep.subr.mxu0 %v1620_v23 }
 0x374   :  { %1243 = vmatpush3.msra.mxu0 %v1620_v23 }
 0x375   :  { %1244 = vmatprep.subr.mxu0 %v1624_v24 }
 0x376   :  { %1245 = vmatpush3.msra.mxu0 %v1624_v24 }
 0x377   :  { %1246 = vmatprep.subr.mxu0 %v1628_v25 }
 0x378   :  { %1247 = vmatpush3.msra.mxu0 %v1628_v25 }
 0x379   :  { %1248 = vmatprep.subr.mxu0 %v1632_v26 }
 0x37a   :  { %1249 = vmatpush3.msra.mxu0 %v1632_v26 }
 0x37b   :  { %1250 = vmatprep.subr.mxu0 %v1673_v40 }
 0x37c   :  { %1251 = vmatpush3.msra.mxu0 %v1673_v40  ;;  %v68_v40 = vld [vmem:[#allocation5 + $0x58] sm:$0xff] }
 0x37d   :  { %1252 = vmatprep.subr.mxu0 %v1677_v41 }
 0x37e   :  { %1253 = vmatpush3.msra.mxu0 %v1677_v41  ;;  %v67_v41 = vld [vmem:[#allocation5 + $0x50] sm:$0xff] }
 0x37f   :  { %1254 = vmatprep.subr.mxu0 %v1681_v42 }
 0x380   :  { %1255 = vmatpush3.msra.mxu0 %v1681_v42 }
 0x381   :  { %1256 = vmatprep.subr.mxu0 %v1685_v43 }
 0x382   :  { %1257 = vmatpush3.msra.mxu0 %v1685_v43 }
 0x383   :  { %1258 = vmatprep.subr.mxu0 %v1689_v44 }
 0x384   :  { %1259 = vmatpush3.msra.mxu0 %v1689_v44 }
 0x385   :  { %1260 = vmatprep.subr.mxu0 %v1693_v45 }
 0x386   :  { %1261 = vmatpush3.msra.mxu0 %v1693_v45 }
 0x387   :  { %1262 = vmatprep.subr.mxu0 %v1695_v46 }
 0x388   :  { %1263 = vmatpush3.msra.mxu0 %v1695_v46 }
 0x389   :  { %1264 = vmatprep.subr.mxu0 %v1699_v47 }
 0x38a   :  { %1265 = vmatpush3.msra.mxu0 %v1699_v47 }
 0x38b   :  { %1266 = vmatprep.subr.mxu0 %v1703_v48 }
 0x38c   :  { %1267 = vmatpush3.msra.mxu0 %v1703_v48 }
 0x38d   :  { %1268 = vmatprep.subr.mxu0 %v1707_v49 }
 0x38e   :  { %1269 = vmatpush3.msra.mxu0 %v1707_v49 }
 0x38f   :  { %1276 = vmatprep.subr.mxu0 %v72_v36 }
 0x42f   :  { %v1196_v17 = vpop.f32.mrf.mxu0 }
 0x430   :  { %v577_v18 = vadd.f32 %v1196_v17, %v1758_v63 }
 0x431   :  { %v571_v19 = vpop.f32.mrf.mxu0 }
 0x432   :  { %v572_v20 = vadd.f32 %v1758_v63, %v571_v19 }
 0x433   :  { %v1199_v21 = vpop.f32.mrf.mxu0 }
 0x434   :  { %1383 = vtanh.f32 %v572_v20  ;;  %v587_v22 = vadd.f32 %v1199_v21, %v1758_v63 }
 0x435   :  { %1385 = vtanh.f32 %v577_v18  ;;  %v581_v23 = vpop.f32.mrf.mxu0 }
 0x436   :  { %v582_v24 = vadd.f32 %v1758_v63, %v581_v23 }
 0x438   :  { %1387 = vtanh.f32 %v582_v24 }
 0x439   :  { %1389 = vtanh.f32 %v587_v22 }
 0x441   :  { %v1384_v25 = vpop.eup %1383 }
 0x442   :  { %v1386_v26 = vpop.eup %1385  ;;  %1232 = vmatprep.mubr.f32.mxu1 %v1384_v25 }
 0x443   :  { %1233 = vmatmul.mubr.f32.vlgmr.msra.gmra.mxu1 %v1386_v26 }
 0x444   :  { %1330 = vmatpush3.msra.mxu1 %v72_v36 }
 0x445   :  { %v1388_v34 = vpop.eup %1387  ;;  %1315 = vmatprep.subr.mxu1 %v71_v37 }
 0x446   :  { %v1390_v35 = vpop.eup %1389  ;;  %1235 = vmatprep.mubr.f32.mxu1 %v1388_v34  ;;  %1331 = vmatpush3.msra.mxu1 %v71_v37 }
 0x447   :  { %1236 = vmatmul.mubr.f32.gmra.mxu1 %v1390_v35  ;;  %1316 = vmatprep.subr.mxu1 %v70_v38 }
 0x448   :  { %1332 = vmatpush3.msra.mxu1 %v70_v38 }
 0x449   :  { %1317 = vmatprep.subr.mxu1 %v69_v39 }
 0x44a   :  { %1333 = vmatpush3.msra.mxu1 %v69_v39 }
 0x44b   :  { %1318 = vmatprep.subr.mxu1 %v68_v40 }
 0x44c   :  { %1334 = vmatpush3.msra.mxu1 %v68_v40 }
 0x44d   :  { %1319 = vmatprep.subr.mxu1 %v67_v41 }
 0x44e   :  { %1335 = vmatpush3.msra.mxu1 %v67_v41 }
 0x503   :  { %v1234_v42 = vpop.f32.mrf.mxu1 }
 0x504   :  { %v666_v43 = vadd.f32 %v1234_v42, %v1717_v50 }
 0x505   :  { %v660_v44 = vpop.f32.mrf.mxu1 }
 0x506   :  { %v661_v45 = vadd.f32 %v1717_v50, %v660_v44 }
 0x507   :  { %v1237_v46 = vpop.f32.mrf.mxu1 }
 0x508   :  { %1391 = vtanh.f32 %v661_v45  ;;  %v676_v47 = vadd.f32 %v1237_v46, %v1717_v50 }
 0x509   :  { %1393 = vtanh.f32 %v666_v43  ;;  %v670_v48 = vpop.f32.mrf.mxu1 }
 0x50a   :  { %v671_v49 = vadd.f32 %v1717_v50, %v670_v48  ;;  %v66_v50 = vld [vmem:[#allocation5 + $0x48] sm:$0xff] }
 0x50b   :  { %1320 = vmatprep.subr.mxu1 %v66_v50 }
 0x50c   :  { %1395 = vtanh.f32 %v671_v49  ;;  %1336 = vmatpush3.msra.mxu1 %v66_v50 }
 0x50d   :  { %1397 = vtanh.f32 %v676_v47  ;;  %1321 = vmatprep.subr.mxu1 %v65_v55 }
 0x50e   :  { %1337 = vmatpush3.msra.mxu1 %v65_v55 }
 0x50f   :  { %1322 = vmatprep.subr.mxu1 %v64_v56 }
 0x510   :  { %1338 = vmatpush3.msra.mxu1 %v64_v56 }
 0x511   :  { %1323 = vmatprep.subr.mxu1 %v63_v57 }
 0x512   :  { %1339 = vmatpush3.msra.mxu1 %v63_v57 }
 0x513   :  { %1324 = vmatprep.subr.mxu1 %v62_v58 }
 0x514   :  { %1340 = vmatpush3.msra.mxu1 %v62_v58 }
 0x515   :  { %v1392_v51 = vpop.eup %1391  ;;  %1325 = vmatprep.subr.mxu1 %v61_v59 }
 0x516   :  { %v1394_v52 = vpop.eup %1393  ;;  %1270 = vmatprep.mubr.f32.mxu0 %v1392_v51  ;;  %1341 = vmatpush3.msra.mxu1 %v61_v59 }
 0x517   :  { %1271 = vmatmul.mubr.f32.vlgmr.msra.gmra.mxu0 %v1394_v52  ;;  %1326 = vmatprep.subr.mxu1 %v60_v60 }
 0x518   :  { %1277 = vmatpush3.msra.mxu0 %v72_v36  ;;  %1342 = vmatpush3.msra.mxu1 %v60_v60 }
 0x519   :  { %v1396_v53 = vpop.eup %1395  ;;  %1278 = vmatprep.subr.mxu0 %v71_v37  ;;  %1327 = vmatprep.subr.mxu1 %v59_v61 }
 0x51a   :  { %v1398_v54 = vpop.eup %1397  ;;  %1273 = vmatprep.mubr.f32.mxu0 %v1396_v53  ;;  %1279 = vmatpush3.msra.mxu0 %v71_v37 }
 0x51b   :  { %1274 = vmatmul.mubr.f32.gmra.mxu0 %v1398_v54  ;;  %1280 = vmatprep.subr.mxu0 %v70_v38 }
 0x51c   :  { %1281 = vmatpush3.msra.mxu0 %v70_v38  ;;  %1343 = vmatpush3.msra.mxu1 %v59_v61 }
 0x51d   :  { %1282 = vmatprep.subr.mxu0 %v69_v39  ;;  %1328 = vmatprep.subr.mxu1 %v58_v62 }
 0x51e   :  { %1283 = vmatpush3.msra.mxu0 %v69_v39  ;;  %1344 = vmatpush3.msra.mxu1 %v58_v62 }
 0x51f   :  { %1284 = vmatprep.subr.mxu0 %v68_v40  ;;  %1329 = vmatprep.subr.mxu1 %v57_v0 }
 0x520   :  { %1285 = vmatpush3.msra.mxu0 %v68_v40  ;;  %1345 = vmatpush3.msra.mxu1 %v57_v0 }
 0x521   :  { %1286 = vmatprep.subr.mxu0 %v67_v41 }
 0x522   :  { %1287 = vmatpush3.msra.mxu0 %v67_v41 }
 0x523   :  { %1288 = vmatprep.subr.mxu0 %v66_v50 }
 0x524   :  { %1289 = vmatpush3.msra.mxu0 %v66_v50 }
 0x525   :  { %1290 = vmatprep.subr.mxu0 %v65_v55 }
 0x526   :  { %1291 = vmatpush3.msra.mxu0 %v65_v55 }
 0x527   :  { %1292 = vmatprep.subr.mxu0 %v64_v56 }
 0x528   :  { %1293 = vmatpush3.msra.mxu0 %v64_v56 }
 0x529   :  { %1294 = vmatprep.subr.mxu0 %v63_v57 }
 0x52a   :  { %1295 = vmatpush3.msra.mxu0 %v63_v57 }
 0x52b   :  { %1296 = vmatprep.subr.mxu0 %v62_v58 }
 0x52c   :  { %1297 = vmatpush3.msra.mxu0 %v62_v58 }
 0x52d   :  { %1298 = vmatprep.subr.mxu0 %v61_v59 }
 0x52e   :  { %1299 = vmatpush3.msra.mxu0 %v61_v59 }
 0x52f   :  { %1300 = vmatprep.subr.mxu0 %v60_v60 }
 0x530   :  { %1301 = vmatpush3.msra.mxu0 %v60_v60 }
 0x531   :  { %1302 = vmatprep.subr.mxu0 %v59_v61 }
 0x532   :  { %1303 = vmatpush3.msra.mxu0 %v59_v61 }
 0x533   :  { %1304 = vmatprep.subr.mxu0 %v58_v62 }
 0x534   :  { %1305 = vmatpush3.msra.mxu0 %v58_v62 }
 0x535   :  { %1306 = vmatprep.subr.mxu0 %v57_v0 }
 0x536   :  { %1307 = vmatpush3.msra.mxu0 %v57_v0 }
 0x5d7   :  { %v1272_v1 = vpop.f32.mrf.mxu0 }
 0x5d8   :  { %v755_v2 = vadd.f32 %v1272_v1, %v1758_v63 }
 0x5d9   :  { %v749_v3 = vpop.f32.mrf.mxu0 }
 0x5da   :  { %v750_v7 = vadd.f32 %v1758_v63, %v749_v3 }
 0x5db   :  { %v1275_v27 = vpop.f32.mrf.mxu0 }
 0x5dc   :  { %1399 = vtanh.f32 %v750_v7  ;;  %v765_v28 = vadd.f32 %v1275_v27, %v1758_v63 }
 0x5dd   :  { %1401 = vtanh.f32 %v755_v2  ;;  %v759_v29 = vpop.f32.mrf.mxu0 }
 0x5de   :  { %v760_v30 = vadd.f32 %v1758_v63, %v759_v29 }
 0x5e0   :  { %1403 = vtanh.f32 %v760_v30 }
 0x5e1   :  { %1405 = vtanh.f32 %v765_v28 }
 0x5e9   :  { %v1400_v31 = vpop.eup %1399 }
 0x5ea   :  { %v1402_v32 = vpop.eup %1401  ;;  %1308 = vmatprep.mubr.f32.mxu0 %v1400_v31 }
 0x5eb   :  { %1309 = vmatmul.mubr.f32.vlgmr.msra.gmra.mxu0 %v1402_v32 }
 0x5ed   :  { %v1404_v33 = vpop.eup %1403 }
 0x5ee   :  { %v1406_v4 = vpop.eup %1405  ;;  %1311 = vmatprep.mubr.f32.mxu1 %v1404_v33 }
 0x5ef   :  { %1312 = vmatmul.mubr.f32.vlgmr.msra.gmra.mxu1 %v1406_v4 }
 0x6ab   :  { %v1310_v6 = vpop.f32.mrf.mxu0 }
 0x6ac   :  { %v850_v8 = vadd.f32 %v1310_v6, %v894_v5 }
 0x6ad   :  { %v844_v9 = vpop.f32.mrf.mxu0 }
 0x6ae   :  { %864 = vst [vmem:[#allocation7 + $0x8] sm:$0xff] %v850_v8  ;;  %v845_v10 = vadd.f32 %v894_v5, %v844_v9 }
 0x6af   :  { %v1313_v63 = vpop.f32.mrf.mxu1 }
 0x6b0   :  { %863 = vst [vmem:[#allocation7] sm:$0xff] %v845_v10  ;;  %v860_v11 = vadd.f32 %v1313_v63, %v894_v5 }
 0x6b1   :  { %v854_v12 = vpop.f32.mrf.mxu1 }
 0x6b2   :  { %866 = vst [vmem:[#allocation7 + $0x18] sm:$0xff] %v860_v11  ;;  %v855_v13 = vadd.f32 %v894_v5, %v854_v12 }
 0x6b4   :  { %865 = vst [vmem:[#allocation7 + $0x10] sm:$0xff] %v855_v13 }
 0x6b5   :  { %1458 = shalt.err (!%p1455_p0)
}
 0x6b6   :  { %878 = dma.vmem_to_hbm [thread:$0]  %s873_s26, 512, %s1858_s7, [#allocation4], %s1474_s27, %s1474_s27, %s1475_s28  }
 0x6b7   :  { %1471 = dma.done.wait [#allocation4], 512  }
 0x6b8   :  { %1472 = vsyncadd [#allocation4], 4294966784 }
 0x6b9   :  { %882 = vsyncpa [#allocation3], 1 }
 0x6ba   :  { %883 = vsyncpa [#allocation6], 1 }
 0x6bb   :  { %884 = vsyncpa [#allocation4], 1 }

</bundles_post_ra>
